<compile_context>
chip_gen: v6e
topology: v6e:2x2x1
jax: 0.10.0
libtpu: 0.0.40
codegen_flags: <defaults>
</compile_context>

<pallas_src>
import functools

import numpy as np

import jax
import jax.numpy as jnp
from jax.experimental import pallas as pl
from jax.experimental.pallas import tpu as pltpu


def _round_up(x, m):
    return ((x + m - 1) // m) * m


# ----------------------------- Pallas kernel ------------------------------- #

def _lf4s_kernel(ft_ref, fp_ref, cos_ref, sin_ref, scale_ref,
                 dsq_ref, ssq_ref, alog_ref, *, eps):
    """One (TM, n_fft) row-block of frames for BOTH signals.

    ft_ref / fp_ref : (TM, n_fft)    true / pred frames (separate inputs)
    cos_ref/sin_ref : (n_fft, n_freq) window-folded rDFT bases (resident,
                                      lane-0 aligned -> re/im need no shuffles)
    scale_ref       : (1, n_freq)    log-freq scale / sqrt(sum(w^2))
    outputs         : (TM, 1)        per-row lane-reduced partials
                                     [diff^2, sum^2, |log ratio|]
    """
    cosb = cos_ref[...]
    sinb = sin_ref[...]
    scale = scale_ref[...]

    def scaled_spec(frames):
        # Two MXU matmuls sharing the LHS tile; f32 accumulate, f32 post-matmul math.
        re = jnp.dot(frames, cosb, preferred_element_type=jnp.float32)
        im = jnp.dot(frames, sinb, preferred_element_type=jnp.float32)
        return jnp.sqrt(re * re + im * im) * scale + eps

    s_t = scaled_spec(ft_ref[...])
    s_p = scaled_spec(fp_ref[...])

    diff = s_t - s_p
    ssum = s_t + s_p
    # One log per element: log(a) - log(b) == log(a/b).  Exact divide kept for
    # bit-fidelity (approx reciprocal is an optional EUP micro-opt at scale).
    alog = jnp.abs(jnp.log(s_t / s_p))

    # Lane-axis partial sums stored as vectors; no per-batch scalar SMEM epilogue.
    dsq_ref[...] = jnp.sum(diff * diff, axis=1, keepdims=True)
    ssq_ref[...] = jnp.sum(ssum * ssum, axis=1, keepdims=True)
    alog_ref[...] = jnp.sum(alog, axis=1, keepdims=True)


# ------------------------- host-side constants ----------------------------- #

def _hann_window_np(n_fft):
    # torch.hann_window(n_fft, periodic=True)
    i = np.arange(n_fft, dtype=np.float64)
    return 0.5 - 0.5 * np.cos(2.0 * np.pi * i / n_fft)


@functools.lru_cache(maxsize=None)
def _dft_constants(n_fft, window_fn):
    """Window-folded rDFT bases + normalized log-frequency scale (numpy, cached)."""
    n_freq = n_fft // 2 + 1
    w = np.asarray(window_fn(n_fft), dtype=np.float64)
    n = np.arange(n_fft, dtype=np.float64)
    k = np.arange(n_freq, dtype=np.float64)
    ang = 2.0 * np.pi * n[:, None] * k[None, :] / n_fft
    cosb = (w[:, None] * np.cos(ang)).astype(np.float32)            # (n_fft, n_freq)
    sinb = (w[:, None] * np.sin(ang)).astype(np.float32)
    # Spectrogram(normalized=True) window norm folded into the log-frequency scale.
    lfs = np.log2(np.arange(n_freq, dtype=np.float64) + 2.0) / np.log2(float(n_fft))
    scale = (lfs / np.sqrt(np.sum(w * w))).astype(np.float32)[None, :]  # (1, n_freq)
    return cosb, sinb, scale


# ------------------------------ JAX glue ----------------------------------- #

def _frame_signal(x, n_fft):
    """F.pad(constant) + stft center=True reflect pad + hop==n_fft framing via a
    plain reshape (non-overlapping), dropping first/last frame (spec[:, :, 1:-1])."""
    pad = n_fft // 2
    x1 = jnp.pad(x, ((0, 0), (pad, pad)), mode="constant")
    x2 = jnp.pad(x1, ((0, 0), (pad, pad)), mode="reflect")
    B, L2 = x2.shape
    n_frames = L2 // n_fft
    frames = x2[:, :n_frames * n_fft].reshape(B, n_frames, n_fft)
    return frames[:, 1:-1, :]


def lf4s_loss(x_true, x_pred, n_fft=111, alpha=1.0, eps=1e-7,
              window_fn=_hann_window_np, matmul_dtype=jnp.float32,
              block_rows=256):
    """LF4SLoss.forward (overlap=0 -> hop_length = n_fft).

    block_rows : M-axis (frame-row) tile size; the grid axis is "parallel" and
                 every block writes its own output rows, so v7x's two TensorCores
                 both engage once T is large.
    matmul_dtype=bfloat16 halves frame DMA bytes and uses the native bf16 MXU but
    only pays once the tiled problem is MXU/HBM-bound; default stays float32.
    """
    B = x_true.shape[0]
    n_freq = n_fft // 2 + 1

    ft = _frame_signal(x_true.astype(jnp.float32), n_fft)   # (B, T, n_fft)
    fp = _frame_signal(x_pred.astype(jnp.float32), n_fft)
    T = ft.shape[1]
    bt = B * T

    # Row tiling; pad with zero rows (masked exactly by slicing [:bt] afterwards).
    tm = _round_up(max(8, min(block_rows, _round_up(bt, 8))), 8)
    m_pad = _round_up(bt, tm)

    def prep(frames):
        f = frames.reshape(bt, n_fft)
        if m_pad > bt:
            f = jnp.pad(f, ((0, m_pad - bt), (0, 0)))
        return f.astype(matmul_dtype)

    ft2 = prep(ft)   # (m_pad, n_fft) — true and pred stay separate kernel inputs
    fp2 = prep(fp)

    cosb_np, sinb_np, scale_np = _dft_constants(n_fft, window_fn)
    cosb = jnp.asarray(cosb_np, dtype=matmul_dtype)
    sinb = jnp.asarray(sinb_np, dtype=matmul_dtype)
    scale = jnp.asarray(scale_np)                            # f32 post-matmul math

    grid_m = m_pad // tm
    itemsize = jnp.dtype(matmul_dtype).itemsize
    cost = pl.CostEstimate(
        flops=int(8 * m_pad * n_fft * n_freq + 16 * m_pad * n_freq),
        transcendentals=int(4 * m_pad * n_freq),             # 2 sqrt + log + div
        bytes_accessed=int(2 * m_pad * n_fft * itemsize
                           + 2 * n_fft * n_freq * itemsize
                           + n_freq * 4 + 3 * m_pad * 4),
    )

    frame_spec = pl.BlockSpec((tm, n_fft), lambda m: (m, 0))
    basis_spec = pl.BlockSpec((n_fft, n_freq), lambda m: (0, 0))   # resident
    scale_spec = pl.BlockSpec((1, n_freq), lambda m: (0, 0))       # resident
    row_spec = pl.BlockSpec((tm, 1), lambda m: (m, 0))             # per-block output

    dsq, ssq, alo = pl.pallas_call(
        functools.partial(_lf4s_kernel, eps=float(eps)),
        grid=(grid_m,),
        in_specs=[frame_spec, frame_spec, basis_spec, basis_spec, scale_spec],
        out_specs=(row_spec, row_spec, row_spec),
        out_shape=(jax.ShapeDtypeStruct((m_pad, 1), jnp.float32),
                   jax.ShapeDtypeStruct((m_pad, 1), jnp.float32),
                   jax.ShapeDtypeStruct((m_pad, 1), jnp.float32)),
        compiler_params=pltpu.CompilerParams(
            dimension_semantics=("parallel",)),
        cost_estimate=cost,
    )(ft2, fp2, cosb, sinb, scale)

    # Tiny per-batch finish in plain JAX; padded rows never enter (exact).
    dsq_b = jnp.sum(dsq[:bt, 0].reshape(B, T), axis=1)
    ssq_b = jnp.sum(ssq[:bt, 0].reshape(B, T), axis=1)
    converge_term = jnp.mean(jnp.sqrt(dsq_b) / jnp.sqrt(ssq_b))
    log_term = jnp.sum(alo[:bt, 0]) / (B * n_freq * T)       # F.l1_loss mean
    return converge_term + alpha * log_term


# --------------------------------- main ------------------------------------ #

if __name__ == "__main__":
    key = jax.random.PRNGKey(0)
    k1, k2 = jax.random.split(key)

    B, L = 2, 512
    n_fft = 64        # small, MXU/lane friendly; module default n_fft=111 also supported

    x_true = jax.random.normal(k1, (B, L), dtype=jnp.float32)
    x_pred = jax.random.normal(k2, (B, L), dtype=jnp.float32)

    # block_rows=8 at this tiny size exercises the multi-block "parallel" grid path.
    loss_fn = jax.jit(functools.partial(lf4s_loss, n_fft=n_fft, alpha=1.0,
                                        eps=1e-7, block_rows=8))
    loss = loss_fn(x_true, x_pred)
    jax.block_until_ready(loss)

    assert loss.shape == () and bool(jnp.isfinite(loss))
    print("KERNEL_OK")
</pallas_src>

<mosaic_0001>
module attributes {stable_mosaic.version = 11 : i64} {
  func.func @_lf4s_kernel(%arg0: i32, %arg1: memref<8x64xf32, #tpu.memory_space<vmem>>, %arg2: memref<8x64xf32, #tpu.memory_space<vmem>>, %arg3: memref<64x33xf32, #tpu.memory_space<vmem>>, %arg4: memref<64x33xf32, #tpu.memory_space<vmem>>, %arg5: memref<1x33xf32, #tpu.memory_space<vmem>>, %arg6: memref<8x1xf32, #tpu.memory_space<vmem>>, %arg7: memref<8x1xf32, #tpu.memory_space<vmem>>, %arg8: memref<8x1xf32, #tpu.memory_space<vmem>>) attributes {dimension_semantics = [#tpu.dimension_semantics<parallel>], iteration_bounds = array<i64: 2>, scalar_prefetch = 0 : i64, scratch_operands = 0 : i64, tpu.core_type = #tpu.core_type<tc>, window_params = [{transform_indices = @transform_0, window_bounds = array<i64: 8, 64>}, {transform_indices = @transform_1, window_bounds = array<i64: 8, 64>}, {pipeline_mode = #tpu.pipeline_mode<synchronous>, transform_indices = @transform_2, window_bounds = array<i64: 64, 33>}, {pipeline_mode = #tpu.pipeline_mode<synchronous>, transform_indices = @transform_3, window_bounds = array<i64: 64, 33>}, {pipeline_mode = #tpu.pipeline_mode<synchronous>, transform_indices = @transform_4, window_bounds = array<i64: 1, 33>}, {transform_indices = @transform_5, window_bounds = array<i64: 8, 1>}, {transform_indices = @transform_6, window_bounds = array<i64: 8, 1>}, {transform_indices = @transform_7, window_bounds = array<i64: 8, 1>}]} {
    %c0 = arith.constant 0 : index
    %c0_0 = arith.constant 0 : index
    %0 = vector.load %arg3[%c0, %c0_0] : memref<64x33xf32, #tpu.memory_space<vmem>>, vector<64x33xf32>
    %c0_1 = arith.constant 0 : index
    %c0_2 = arith.constant 0 : index
    %1 = vector.load %arg4[%c0_1, %c0_2] : memref<64x33xf32, #tpu.memory_space<vmem>>, vector<64x33xf32>
    %c0_3 = arith.constant 0 : index
    %c0_4 = arith.constant 0 : index
    %2 = vector.load %arg5[%c0_3, %c0_4] : memref<1x33xf32, #tpu.memory_space<vmem>>, vector<1x33xf32>
    %c0_5 = arith.constant 0 : index
    %c0_6 = arith.constant 0 : index
    %3 = vector.load %arg1[%c0_5, %c0_6] : memref<8x64xf32, #tpu.memory_space<vmem>>, vector<8x64xf32>
    %cst = arith.constant dense<0.000000e+00> : vector<8x33xf32>
    %4 = tpu.matmul %3, %0, %cst {dimension_numbers = #tpu.dot_dimension_numbers<[1], [0], [0], [1], [0, 0, 1, 1], [], []>} : vector<8x64xf32>, vector<64x33xf32>, vector<8x33xf32> -> vector<8x33xf32>
    %cst_7 = arith.constant dense<0.000000e+00> : vector<8x33xf32>
    %5 = tpu.matmul %3, %1, %cst_7 {dimension_numbers = #tpu.dot_dimension_numbers<[1], [0], [0], [1], [0, 0, 1, 1], [], []>} : vector<8x64xf32>, vector<64x33xf32>, vector<8x33xf32> -> vector<8x33xf32>
    %6 = arith.mulf %4, %4 : vector<8x33xf32>
    %7 = arith.mulf %5, %5 : vector<8x33xf32>
    %8 = arith.addf %6, %7 : vector<8x33xf32>
    %9 = math.sqrt %8 : vector<8x33xf32>
    %10 = vector.broadcast %2 : vector<1x33xf32> to vector<8x33xf32>
    %11 = arith.mulf %9, %10 : vector<8x33xf32>
    %cst_8 = arith.constant 1.000000e-07 : f32
    %12 = vector.broadcast %cst_8 : f32 to vector<8x33xf32>
    %13 = arith.addf %11, %12 : vector<8x33xf32>
    %c0_9 = arith.constant 0 : index
    %c0_10 = arith.constant 0 : index
    %14 = vector.load %arg2[%c0_9, %c0_10] : memref<8x64xf32, #tpu.memory_space<vmem>>, vector<8x64xf32>
    %cst_11 = arith.constant dense<0.000000e+00> : vector<8x33xf32>
    %15 = tpu.matmul %14, %0, %cst_11 {dimension_numbers = #tpu.dot_dimension_numbers<[1], [0], [0], [1], [0, 0, 1, 1], [], []>} : vector<8x64xf32>, vector<64x33xf32>, vector<8x33xf32> -> vector<8x33xf32>
    %cst_12 = arith.constant dense<0.000000e+00> : vector<8x33xf32>
    %16 = tpu.matmul %14, %1, %cst_12 {dimension_numbers = #tpu.dot_dimension_numbers<[1], [0], [0], [1], [0, 0, 1, 1], [], []>} : vector<8x64xf32>, vector<64x33xf32>, vector<8x33xf32> -> vector<8x33xf32>
    %17 = arith.mulf %15, %15 : vector<8x33xf32>
    %18 = arith.mulf %16, %16 : vector<8x33xf32>
    %19 = arith.addf %17, %18 : vector<8x33xf32>
    %20 = math.sqrt %19 : vector<8x33xf32>
    %21 = vector.broadcast %2 : vector<1x33xf32> to vector<8x33xf32>
    %22 = arith.mulf %20, %21 : vector<8x33xf32>
    %cst_13 = arith.constant 1.000000e-07 : f32
    %23 = vector.broadcast %cst_13 : f32 to vector<8x33xf32>
    %24 = arith.addf %22, %23 : vector<8x33xf32>
    %25 = arith.subf %13, %24 : vector<8x33xf32>
    %26 = arith.addf %13, %24 : vector<8x33xf32>
    %27 = arith.divf %13, %24 : vector<8x33xf32>
    %28 = math.log %27 : vector<8x33xf32>
    %29 = math.absf %28 : vector<8x33xf32>
    %30 = arith.mulf %25, %25 : vector<8x33xf32>
    %cst_14 = arith.constant dense<0.000000e+00> : vector<8xf32>
    %31 = vector.multi_reduction <add>, %30, %cst_14 [1] : vector<8x33xf32> to vector<8xf32>
    %32 = vector.shape_cast %31 : vector<8xf32> to vector<8x1xf32>
    %c0_15 = arith.constant 0 : index
    %c0_16 = arith.constant 0 : index
    %33 = vector.load %arg6[%c0_15, %c0_16] : memref<8x1xf32, #tpu.memory_space<vmem>>, vector<8x1xf32>
    tpu.vector_store %arg6[%c0_15, %c0_16], %32 {strides = array<i32>} : memref<8x1xf32, #tpu.memory_space<vmem>>, vector<8x1xf32>,
    %34 = arith.mulf %26, %26 : vector<8x33xf32>
    %cst_17 = arith.constant dense<0.000000e+00> : vector<8xf32>
    %35 = vector.multi_reduction <add>, %34, %cst_17 [1] : vector<8x33xf32> to vector<8xf32>
    %36 = vector.shape_cast %35 : vector<8xf32> to vector<8x1xf32>
    %c0_18 = arith.constant 0 : index
    %c0_19 = arith.constant 0 : index
    %37 = vector.load %arg7[%c0_18, %c0_19] : memref<8x1xf32, #tpu.memory_space<vmem>>, vector<8x1xf32>
    tpu.vector_store %arg7[%c0_18, %c0_19], %36 {strides = array<i32>} : memref<8x1xf32, #tpu.memory_space<vmem>>, vector<8x1xf32>,
    %cst_20 = arith.constant dense<0.000000e+00> : vector<8xf32>
    %38 = vector.multi_reduction <add>, %29, %cst_20 [1] : vector<8x33xf32> to vector<8xf32>
    %39 = vector.shape_cast %38 : vector<8xf32> to vector<8x1xf32>
    %c0_21 = arith.constant 0 : index
    %c0_22 = arith.constant 0 : index
    %40 = vector.load %arg8[%c0_21, %c0_22] : memref<8x1xf32, #tpu.memory_space<vmem>>, vector<8x1xf32>
    tpu.vector_store %arg8[%c0_21, %c0_22], %39 {strides = array<i32>} : memref<8x1xf32, #tpu.memory_space<vmem>>, vector<8x1xf32>,
    return
  }
  func.func @transform_0(%arg0: i32) -> (i32, i32) {
    %c0_i32 = arith.constant 0 : i32
    %c0_i32_0 = arith.constant 0 : i32
    return %arg0, %c0_i32 : i32, i32
  }
  func.func @transform_1(%arg0: i32) -> (i32, i32) {
    %c0_i32 = arith.constant 0 : i32
    %c0_i32_0 = arith.constant 0 : i32
    return %arg0, %c0_i32 : i32, i32
  }
  func.func @transform_2(%arg0: i32) -> (i32, i32) {
    %c0_i32 = arith.constant 0 : i32
    %c0_i32_0 = arith.constant 0 : i32
    %c0_i32_1 = arith.constant 0 : i32
    return %c0_i32, %c0_i32_0 : i32, i32
  }
  func.func @transform_3(%arg0: i32) -> (i32, i32) {
    %c0_i32 = arith.constant 0 : i32
    %c0_i32_0 = arith.constant 0 : i32
    %c0_i32_1 = arith.constant 0 : i32
    return %c0_i32, %c0_i32_0 : i32, i32
  }
  func.func @transform_4(%arg0: i32) -> (i32, i32) {
    %c0_i32 = arith.constant 0 : i32
    %c0_i32_0 = arith.constant 0 : i32
    %c0_i32_1 = arith.constant 0 : i32
    return %c0_i32, %c0_i32_0 : i32, i32
  }
  func.func @transform_5(%arg0: i32) -> (i32, i32) {
    %c0_i32 = arith.constant 0 : i32
    %c0_i32_0 = arith.constant 0 : i32
    return %arg0, %c0_i32 : i32, i32
  }
  func.func @transform_6(%arg0: i32) -> (i32, i32) {
    %c0_i32 = arith.constant 0 : i32
    %c0_i32_0 = arith.constant 0 : i32
    return %arg0, %c0_i32 : i32, i32
  }
  func.func @transform_7(%arg0: i32) -> (i32, i32) {
    %c0_i32 = arith.constant 0 : i32
    %c0_i32_0 = arith.constant 0 : i32
    return %arg0, %c0_i32 : i32, i32
  }
}

</mosaic_0001>

<bundles_post_ra>
// kernel: squeeze.4
= control target key start
LH: loop header
LB: loop body
LE: loop exit
PB: predicated region body
PF: predicated region fallthrough
CT: control target
= control target key end

     0   :  { %vm8_vm0 = vcmask 64512   ;;  %s42_s0 = inlined_call_operand.vmem [shape: f32[16], index: 0, kind: input, shape index: {}]   ;;  %s43_s1 = inlined_call_operand.vmem [shape: f32[2,8], index: 1, kind: output, shape index: {}]  }
   0x1   :  { %v5_v0 = vld [vmem:[%s42_s0] sm:$0x1]  ;;  %s25_s0 = smov 120  }
   0x2   :  { %6 = vst [vmem:[#allocation1] sm:$0x1] %v5_v0 }
   0x9   :  { %v10_v1 = vld [vmem:[#allocation1] sm:$0x1]  }
   0xa   :  { %v7_v2 = vld [vmem:[#allocation1] sm:$0x1]   ;;  %11 = vrot.lane.b32.xlu0 %v10_v1, %s25_s0 }
   0xb   :  { %9 = vst.msk [vmem:[#allocation0] sm:$0x1] %vm8_vm0, %v7_v2  }
  0x7c   :  { %v12_v3 = vpop.permute.xlu0 %11  }
  0x7d   :  { %15 = vst.msk [vmem:[#allocation0 + $0x1] sm:$0x1] %vm8_vm0, %v12_v3  }
  0x84   :  { %v20_v4 = vld [vmem:[#allocation0] sm:$0x3] }
  0x85   :  { %23 = vst [vmem:[%s43_s1] sm:$0x3] %v20_v4 }

// kernel: lf4s_loss.1
= control target key start
LH: loop header
LB: loop body
LE: loop exit
PB: predicated region body
PF: predicated region fallthrough
CT: control target
= control target key end

     0   :  { %s995_s24 = smov 0   ;;  %s1123_s0 = inlined_call_operand.vmem [shape: f32[16,64], index: 0, kind: input, shape index: {}]   ;;  %s1124_s1 = inlined_call_operand.vmem [shape: f32[16,64], index: 1, kind: input, shape index: {}]   ;;  %s1125_s2 = inlined_call_operand.vmem [shape: f32[64,33], index: 2, kind: input, shape index: {}]   ;;  %s1126_s3 = inlined_call_operand.vmem [shape: f32[64,33], index: 3, kind: input, shape index: {}]   ;;  %s1127_s4 = inlined_call_operand.vmem [shape: f32[1,33], index: 4, kind: input, shape index: {}]   ;;  %s1128_s5 = inlined_call_operand.vmem [shape: f32[16,1], index: 5, kind: output, shape index: {0}]   ;;  %s1129_s6 = inlined_call_operand.vmem [shape: f32[16,1], index: 6, kind: output, shape index: {1}]   ;;  %s1130_s7 = inlined_call_operand.vmem [shape: f32[16,1], index: 7, kind: output, shape index: {2}]  }
   0x1 LB: > { %s798_s25 = sadd.s32 4294967295, %s951_s24   ;;  %p802_p0 = scmp.ge.s32.totalorder %s951_s24, 1  ;;  %s951_s24 = sphi %s995_s24, %s18_s24  }
   0x2   : > { %p250_p1 = scmp.lt.s32.totalorder %s951_s24, 3 }
   0x4   : > { %p251_p2 = pnand %p802_p0, %p250_p1 }
   0x5   : > { %p292_p3 = scmp.lt.s32.totalorder (!%p251_p2), %s798_s25, 1 }
   0x6   : > { %254 = sbr.rel (%p251_p2) target bundleno = 440 (0x1b8), region = 40 }
   0xb   : > { %v319_v0 = vld [vmem:[%s1125_s2 + $0x38] sm:$0xff]  ;;  %v953_v2 = vmov 0.0   ;;  %v318_v3 = vld [vmem:[%s1125_s2 + $0x30] sm:$0xff]  ;;  %v317_v5 = vld [vmem:[%s1125_s2 + $0x28] sm:$0xff]  ;;  %s1132_s25 = smov (!%p292_p3, %s798_s25), 1  ;;  %vm330_vm0 = vcmask 523264  }
   0xc   : > { %v327_v1 = vld [vmem:[%s1126_s3 + $0x38] sm:$0xff]  ;;  %851 = vmatprep.subr.mxu0 %v953_v2  ;;  %870 = vmatprep.subr.mxu1 %v953_v2  ;;  %v326_v4 = vld [vmem:[%s1126_s3 + $0x30] sm:$0xff]  ;;  %v325_v6 = vld [vmem:[%s1126_s3 + $0x28] sm:$0xff]  ;;  %s1049_s29 = sshll.u32 %s1132_s25, 3  ;;  %vm954_vm1 = vmmov 0   ;;  %vm656_vm6 = vcmask 269312  }
   0xd   : > { %852 = vmatpush3.msra.mxu0 %v319_v0  ;;  %871 = vmatpush3.msra.mxu1 %v327_v1  ;;  %v316_v7 = vld [vmem:[%s1125_s2 + $0x20] sm:$0xff]  ;;  %v315_v9 = vld [vmem:[%s1125_s2 + $0x18] sm:$0xff]  ;;  %v314_v11 = vld [vmem:[%s1125_s2 + $0x10] sm:$0xff]  ;;  %s295_s12 = scalar_lea.vmem %s1123_s0, %s1049_s29  ;;  %s299_s19 = scalar_lea.vmem %s1124_s1, %s1049_s29  ;;  %vm660_vm7 = vcmask 7168  }
   0xe   : > { %853 = vmatprep.subr.mxu0 %v953_v2  ;;  %872 = vmatprep.subr.mxu1 %v953_v2  ;;  %v324_v8 = vld [vmem:[%s1126_s3 + $0x20] sm:$0xff]  ;;  %v323_v10 = vld [vmem:[%s1126_s3 + $0x18] sm:$0xff]  ;;  %v322_v12 = vld [vmem:[%s1126_s3 + $0x10] sm:$0xff]  ;;  %s303_s26 = scalar_lea.vmem %s1128_s5, %s1049_s29  ;;  %s307_s30 = scalar_lea.vmem %s1129_s6, %s1049_s29 }
   0xf   : > { %854 = vmatpush3.msra.mxu0 %v318_v3  ;;  %873 = vmatpush3.msra.mxu1 %v326_v4  ;;  %v313_v13 = vld [vmem:[%s1125_s2 + $0x8] sm:$0xff]  ;;  %v312_v15 = vld [vmem:[%s1125_s2] sm:$0xff]  ;;  %s311_s10 = scalar_lea.vmem %s1130_s7, %s1049_s29 }
  0x10   : > { %855 = vmatprep.subr.mxu0 %v953_v2  ;;  %874 = vmatprep.subr.mxu1 %v953_v2  ;;  %v321_v14 = vld [vmem:[%s1126_s3 + $0x8] sm:$0xff]  ;;  %v320_v16 = vld [vmem:[%s1126_s3] sm:$0xff] }
  0x11   : > { %856 = vmatpush3.msra.mxu0 %v317_v5  ;;  %875 = vmatpush3.msra.mxu1 %v325_v6  ;;  %v329_v17 = vld [vmem:[%s295_s12] sm:$0xff] }
  0x12   : > { %857 = vmatprep.subr.mxu0 %v953_v2  ;;  %876 = vmatprep.subr.mxu1 %v953_v2  ;;  %v492_v18 = vld [vmem:[%s299_s19] sm:$0xff] }
  0x13   : > { %858 = vmatpush3.msra.mxu0 %v316_v7  ;;  %877 = vmatpush3.msra.mxu1 %v324_v8  ;;  %v810_v38 = vld [vmem:[%s1127_s4] ss:$0 sm:$0xff] }
  0x14   : > { %859 = vmatprep.subr.mxu0 %v953_v2  ;;  %878 = vmatprep.subr.mxu1 %v953_v2 }
  0x15   : > { %860 = vmatpush3.msra.mxu0 %v315_v9  ;;  %879 = vmatpush3.msra.mxu1 %v323_v10 }
  0x16   : > { %861 = vmatprep.subr.mxu0 %v953_v2  ;;  %880 = vmatprep.subr.mxu1 %v953_v2 }
  0x17   : > { %862 = vmatpush3.msra.mxu0 %v314_v11  ;;  %881 = vmatpush3.msra.mxu1 %v322_v12 }
  0x18   : > { %863 = vmatprep.subr.mxu0 %v953_v2  ;;  %882 = vmatprep.subr.mxu1 %v953_v2 }
  0x19   : > { %864 = vmatpush3.msra.mxu0 %v313_v13  ;;  %883 = vmatpush3.msra.mxu1 %v321_v14 }
  0x1a   : > { %865 = vmatprep.subr.mxu0 %v953_v2  ;;  %884 = vmatprep.subr.mxu1 %v953_v2 }
  0x1b   : > { %866 = vmatpush3.msra.mxu0 %v312_v15  ;;  %867 = vmatprep.mubr.msk.f32.mxu0 %vm954_vm1, %v953_v2 }
  0x1c   : > { %885 = vmatpush3.msra.mxu1 %v320_v16  ;;  %886 = vmatprep.mubr.msk.f32.mxu1 %vm954_vm1, %v953_v2 }
  0x1d   : > { %868 = vmatmul.mubr.msk.f32.vlgmr.msra.gmra.mxu0 %vm330_vm0, %v329_v17  ;;  %887 = vmatmul.mubr.msk.f32.vlgmr.msra.gmra.mxu1 %vm330_vm0, %v329_v17 }
  0x1e   : > { %889 = vmatprep.subr.mxu0 %v953_v2  ;;  %908 = vmatprep.subr.mxu1 %v953_v2 }
  0x1f   : > { %890 = vmatpush3.msra.mxu0 %v319_v0  ;;  %909 = vmatpush3.msra.mxu1 %v327_v1 }
  0x20   : > { %891 = vmatprep.subr.mxu0 %v953_v2  ;;  %910 = vmatprep.subr.mxu1 %v953_v2 }
  0x21   : > { %892 = vmatpush3.msra.mxu0 %v318_v3  ;;  %911 = vmatpush3.msra.mxu1 %v326_v4 }
  0x22   : > { %893 = vmatprep.subr.mxu0 %v953_v2  ;;  %912 = vmatprep.subr.mxu1 %v953_v2 }
  0x23   : > { %894 = vmatpush3.msra.mxu0 %v317_v5  ;;  %913 = vmatpush3.msra.mxu1 %v325_v6 }
  0x24   : > { %895 = vmatprep.subr.mxu0 %v953_v2  ;;  %914 = vmatprep.subr.mxu1 %v953_v2 }
  0x25   : > { %896 = vmatpush3.msra.mxu0 %v316_v7  ;;  %915 = vmatpush3.msra.mxu1 %v324_v8 }
  0x26   : > { %897 = vmatprep.subr.mxu0 %v953_v2  ;;  %916 = vmatprep.subr.mxu1 %v953_v2 }
  0x27   : > { %898 = vmatpush3.msra.mxu0 %v315_v9  ;;  %917 = vmatpush3.msra.mxu1 %v323_v10 }
  0x28   : > { %899 = vmatprep.subr.mxu0 %v953_v2  ;;  %918 = vmatprep.subr.mxu1 %v953_v2 }
  0x29   : > { %900 = vmatpush3.msra.mxu0 %v314_v11  ;;  %919 = vmatpush3.msra.mxu1 %v322_v12 }
  0x2a   : > { %901 = vmatprep.subr.mxu0 %v953_v2  ;;  %920 = vmatprep.subr.mxu1 %v953_v2 }
  0x2b   : > { %902 = vmatpush3.msra.mxu0 %v313_v13  ;;  %921 = vmatpush3.msra.mxu1 %v321_v14 }
  0x2c   : > { %903 = vmatprep.subr.mxu0 %v953_v2  ;;  %922 = vmatprep.subr.mxu1 %v953_v2 }
  0x2d   : > { %904 = vmatpush3.msra.mxu0 %v312_v15  ;;  %905 = vmatprep.mubr.msk.f32.mxu0 %vm954_vm1, %v953_v2 }
  0x2e   : > { %923 = vmatpush3.msra.mxu1 %v320_v16  ;;  %924 = vmatprep.mubr.msk.f32.mxu1 %vm954_vm1, %v953_v2 }
  0x2f   : > { %906 = vmatmul.mubr.msk.f32.vlgmr.msra.gmra.mxu0 %vm330_vm0, %v492_v18  ;;  %925 = vmatmul.mubr.msk.f32.vlgmr.msra.gmra.mxu1 %vm330_vm0, %v492_v18 }
  0xdd   : > { %v400_v19 = vpop.f32.mrf.mxu0  ;;  %v470_v20 = vpop.f32.mrf.mxu1 }
  0xde   : > { %v474_v23 = vmul.f32 %v400_v19, %v400_v19  ;;  %v475_v24 = vmul.f32 %v470_v20, %v470_v20 }
  0xdf   : > { %v869_v21 = vpop.f32.mrf.mxu0  ;;  %v888_v22 = vpop.f32.mrf.mxu1 }
  0xe0   : > { %v476_v25 = vadd.f32 %v475_v24, %v474_v23 }
  0xe2   : > { %937 = vrsqrt.f32 %v476_v25  ;;  %vm479_vm2 = vcmp.eq.f32.partialorder %v476_v25, inf  ;;  %v482_v36 = vand.u32 2147483648, %v476_v25  ;;  %vm481_vm3 = vcmp.eq.f32.partialorder %v476_v25, 0.0 }
  0xef   : > { %v562_v26 = vpop.f32.mrf.mxu0  ;;  %v632_v27 = vpop.f32.mrf.mxu1 }
  0xf0   : > { %v636_v28 = vmul.f32 %v562_v26, %v562_v26  ;;  %v637_v29 = vmul.f32 %v632_v27, %v632_v27  ;;  %v938_v33 = vpop.eup %937 }
  0xf1   : > { %v907_v30 = vpop.f32.mrf.mxu0  ;;  %v926_v31 = vpop.f32.mrf.mxu1  ;;  %v478_v34 = vmul.f32 %v938_v33, %v476_v25 }
  0xf2   : > { %v638_v32 = vadd.f32 %v637_v29, %v636_v28 }
  0xf3   : > { %v480_v35 = vsel %vm479_vm2, %v476_v25, %v478_v34 }
  0xf4   : > { %939 = vrsqrt.f32 %v638_v32  ;;  %v483_v39 = vsel %vm481_vm3, %v482_v36, %v480_v35  ;;  %vm641_vm4 = vcmp.eq.f32.partialorder %v638_v32, inf  ;;  %v644_v41 = vand.u32 2147483648, %v638_v32 }
  0xf5   : > { %v490_v42 = vmul.f32 %v810_v38, %v483_v39  ;;  %vm643_vm5 = vcmp.eq.f32.partialorder %v638_v32, 0.0 }
  0xf7   : > { %v491_v46 = vadd.f32 1e-07, %v490_v42 }
 0x101   : > { %v940_v37 = vpop.eup %939 }
 0x102   : > { %v640_v40 = vmul.f32 %v940_v37, %v638_v32 }
 0x104   : > { %v642_v43 = vsel %vm641_vm4, %v638_v32, %v640_v40 }
 0x105   : > { %v645_v44 = vsel %vm643_vm5, %v644_v41, %v642_v43 }
 0x106   : > { %v646_v45 = vmul.f32 %v810_v38, %v645_v44 }
 0x108   : > { %v647_v47 = vadd.f32 1e-07, %v646_v45 }
 0x10a   : > { %v648_v48 = vsub.f32 %v491_v46, %v647_v47  ;;  %941 = vrcp.f32 %v647_v47  ;;  %v649_v49 = vadd.f32 %v647_v47, %v491_v46 }
 0x10c   : > { %v655_v50 = vmul.f32 %v648_v48, %v648_v48  ;;  %v662_v52 = vmul.f32 %v649_v49, %v649_v49 }
 0x10e   : > { %v657_v51 = vsel %vm656_vm6, %v655_v50, 0.0  ;;  %v663_v53 = vsel %vm656_vm6, %v662_v52, 0.0 }
 0x10f   : > { %658 = vadd.xlane.f32.xlu0 %v657_v51 }
 0x113   : > { %664 = vadd.xlane.f32.xlu0 %v663_v53 }
 0x117   : > { %v942_v54 = vpop.eup %941 }
 0x118   : > { %v651_v55 = vmul.f32 %v942_v54, %v491_v46 }
 0x11a   : > { %943 = vlog2.f32 %v651_v55 }
 0x127   : > { %v944_v56 = vpop.eup %943 }
 0x128   : > { %v653_v57 = vmul.f32 0.6931472, %v944_v56 }
 0x12a   : > { %v654_v58 = vand.u32 2147483647, %v653_v57 }
 0x12c   : > { %v667_v59 = vsel %vm656_vm6, %v654_v58, 0.0 }
 0x12d   : > { %668 = vadd.xlane.f32.xlu1 %v667_v59 }
 0x198   : > { %v659_v60 = vpop.xlane.xlu0 %658 }
 0x199   : > { %661 = vst.msk [vmem:[%s303_s26] sm:$0xff] %vm660_vm7, %v659_v60 }
 0x19c   : > { %v665_v61 = vpop.xlane.xlu0 %664 }
 0x19d   : > { %666 = vst.msk [vmem:[%s307_s30] sm:$0xff] %vm660_vm7, %v665_v61 }
 0x1b6   : > { %v669_v62 = vpop.xlane.xlu1 %668 }
 0x1b7   : > { %670 = vst.msk [vmem:[%s311_s10] sm:$0xff] %vm660_vm7, %v669_v62 }
 0x1b8 PF: > { %s18_s24 = sadd.s32 1, %s951_s24  }
 0x1b9   : > { %p15_p4 = scmp.ge.s32.totalorder %s18_s24, 4  }
 0x1bb   :  { %17 = sbr.rel (!%p15_p4) target bundleno = 1 (0x1), region = 97 }

</bundles_post_ra>
